<compile_context>
chip_gen: v5e
topology: v5e:2x2
jax: 0.10.0
libtpu: 0.0.40
codegen_flags: <defaults>
</compile_context>

<pallas_src>
import jax
import jax.numpy as jnp
from jax.experimental import pallas as pl
from jax.experimental.pallas import tpu as pltpu


def _round_up(x: int, m: int) -> int:
    return ((x + m - 1) // m) * m


def _vmem_capacity_bytes() -> int:
    """Per-core VMEM capacity; conservative fallback = v7x's 64 MiB/TC."""
    try:
        return int(pltpu.get_tpu_info().vmem_capacity_bytes)
    except Exception:
        return 64 * 1024 * 1024


def word_embedding_forward(ids: jax.Array, emb_table: jax.Array,
                           *, tokens_per_block: int = 256,
                           force_path: str | None = None) -> jax.Array:
    """Equivalent of WordEmbeddingModel.forward(ids) -> emb_table[ids]."""
    V, D = emb_table.shape
    orig_shape = ids.shape
    dtype = emb_table.dtype
    itemsize = jnp.dtype(dtype).itemsize

    ids_flat = ids.reshape(-1).astype(jnp.int32)
    n = ids_flat.shape[0]

    # Token tile: large (amortizes grid-step overhead), 8-aligned, padded.
    tb = min(tokens_per_block, _round_up(max(n, 1), 8))
    n_pad = _round_up(max(n, 1), tb)
    ids_flat = jnp.pad(ids_flat, (0, n_pad - n))          # pad slots use id 0
    grid_steps = n_pad // tb

    # ---- algorithm selection: VMEM-resident row copy vs HBM DMA gather ----
    table_bytes = V * D * itemsize
    out_pipe_bytes = 2 * tb * D * itemsize                 # double-buffered out tile
    capacity = _vmem_capacity_bytes()
    resident_fits = table_bytes + out_pipe_bytes + (2 << 20) <= int(0.8 * capacity)
    path = force_path if force_path is not None else ("vmem" if resident_fits else "hbm")

    if path == "vmem":
        # Table resident in VMEM (whole-array memory_space spec => single copy,
        # not re-DMA'd / double-buffered per grid step). Per token: one dynamic
        # (1, D) vector load + one (1, D) store. No MXU, no one-hot scratch.
        unroll = tb <= 128

        def kernel(ids_sref, table_ref, out_ref):
            base = pl.program_id(0) * tb

            @pl.loop(0, tb, unroll=unroll)
            def _(j):
                tok = ids_sref[base + j]
                tok = jnp.clip(tok, 0, V - 1)   # PyTorch would raise; we clamp
                out_ref[pl.ds(j, 1), :] = table_ref[pl.ds(tok, 1), :]

        in_specs = [pl.BlockSpec(memory_space=pltpu.MemorySpace.VMEM)]
        scratch_shapes = []
        needed_vmem = table_bytes + out_pipe_bytes + (1 << 20)
        bytes_accessed = table_bytes + n_pad * D * itemsize + n_pad * 4
    else:
        # Table stays in HBM: per grid step, issue one row DMA per token
        # straight into the output VMEM tile, then drain them. All TB row
        # DMAs are in flight concurrently within the step.
        # TODO(synk): cross-step prefetch (issue step i+1's row DMAs into the
        # other output buffer while step i drains) if DMA latency shows up.
        def kernel(ids_sref, table_hbm, out_ref, copy_sem):
            base = pl.program_id(0) * tb

            @pl.loop(0, tb)
            def _(j):
                tok = jnp.clip(ids_sref[base + j], 0, V - 1)
                pltpu.make_async_copy(table_hbm.at[tok], out_ref.at[j],
                                      copy_sem).start()

            @pl.loop(0, tb)
            def _(j):
                # All row copies have identical size; drain one completion
                # per wait on the shared semaphore.
                pltpu.make_async_copy(table_hbm.at[0], out_ref.at[0],
                                      copy_sem).wait()

        in_specs = [pl.BlockSpec(memory_space=pl.ANY)]
        scratch_shapes = [pltpu.SemaphoreType.DMA(())]
        needed_vmem = out_pipe_bytes + (1 << 20)
        bytes_accessed = 2 * n_pad * D * itemsize + n_pad * 4

    vmem_limit = min(max(needed_vmem, 16 << 20), int(0.9 * capacity))

    out_flat = pl.pallas_call(
        kernel,
        out_shape=jax.ShapeDtypeStruct((n_pad, D), dtype),
        grid_spec=pltpu.PrefetchScalarGridSpec(
            num_scalar_prefetch=1,                 # ids -> SMEM
            grid=(grid_steps,),
            in_specs=in_specs,
            out_specs=pl.BlockSpec((tb, D), lambda i, ids: (i, 0)),
            scratch_shapes=scratch_shapes,
        ),
        compiler_params=pltpu.CompilerParams(
            # Megacore sharding only pays off with >= 2 disjoint token tiles.
            dimension_semantics=("parallel",) if grid_steps > 1 else ("arbitrary",),
            vmem_limit_bytes=vmem_limit,
        ),
        cost_estimate=pl.CostEstimate(
            flops=0, transcendentals=0, bytes_accessed=bytes_accessed),
    )(ids_flat, emb_table)

    return out_flat[:n].reshape(orig_shape + (D,))


if __name__ == "__main__":
    # Small, deterministic problem consistent with the module:
    #   vocab_size=64, embedding_dim=128, ids of shape (batch=2, seq=8)
    vocab_size = 64
    embedding_dim = 128
    batch, seq = 2, 8

    key = jax.random.PRNGKey(0)
    k_emb, k_ids = jax.random.split(key)

    # nn.Embedding default init: weights ~ N(0, 1)
    emb_table = jax.random.normal(k_emb, (vocab_size, embedding_dim), dtype=jnp.float32)
    ids = jax.random.randint(k_ids, (batch, seq), 0, vocab_size, dtype=jnp.int32)

    ref = emb_table[ids]  # plain JAX gather == nn.Embedding forward semantics

    # Path A: VMEM-resident table, in-kernel dynamic row copy (small vocab).
    out_vmem = jax.block_until_ready(
        word_embedding_forward(ids, emb_table, force_path="vmem"))
    assert out_vmem.shape == (batch, seq, embedding_dim)
    assert out_vmem.dtype == emb_table.dtype
    assert jnp.array_equal(out_vmem, ref), "VMEM row-copy path mismatch"

    # Path B: table kept in HBM, per-row DMA gather (large-vocab path).
    out_hbm = jax.block_until_ready(
        word_embedding_forward(ids, emb_table, force_path="hbm"))
    assert jnp.array_equal(out_hbm, ref), "HBM DMA-gather path mismatch"

    # Automatic selection (chooses the VMEM path for this tiny table).
    out_auto = jax.block_until_ready(word_embedding_forward(ids, emb_table))
    assert jnp.array_equal(out_auto, ref), "Auto-selected path mismatch"

    print("KERNEL_OK")
</pallas_src>

<mosaic_0001>
module attributes {stable_mosaic.version = 11 : i64} {
  func.func @kernel(%arg0: i32, %arg1: memref<16xi32, #tpu.memory_space<smem>>, %arg2: memref<64x128xf32, #tpu.memory_space<vmem>>, %arg3: memref<16x128xf32, #tpu.memory_space<vmem>>) attributes {dimension_semantics = [#tpu.dimension_semantics<arbitrary>], iteration_bounds = array<i64: 1>, scalar_prefetch = 1 : i64, scratch_operands = 0 : i64, tpu.core_type = #tpu.core_type<tc>, window_params = [{pipeline_mode = #tpu.pipeline_mode<synchronous>, transform_indices = @transform_0, window_bounds = array<i64: 64, 128>}, {transform_indices = @transform_1, window_bounds = array<i64: 16, 128>}]} {
    %c16_i32 = arith.constant 16 : i32
    %0 = arith.muli %arg0, %c16_i32 : i32
    %c0_i32 = arith.constant 0 : i32
    %c1_i32 = arith.constant 1 : i32
    %1 = arith.muli %c0_i32, %c1_i32 : i32
    %c0_i32_0 = arith.constant 0 : i32
    %2 = arith.addi %c0_i32_0, %1 : i32
    %3 = arith.addi %0, %2 : i32
    %4 = arith.index_cast %3 : i32 to index
    %5 = memref.load %arg1[%4] : memref<16xi32, #tpu.memory_space<smem>>
    %c0_i32_1 = arith.constant 0 : i32
    %c63_i32 = arith.constant 63 : i32
    %6 = arith.maxsi %c0_i32_1, %5 : i32
    %7 = arith.minsi %c63_i32, %6 : i32
    %8 = arith.index_cast %7 : i32 to index
    %c0 = arith.constant 0 : index
    %9 = vector.load %arg2[%8, %c0] : memref<64x128xf32, #tpu.memory_space<vmem>>, vector<1x128xf32>
    %10 = arith.index_cast %2 : i32 to index
    %c0_2 = arith.constant 0 : index
    %11 = vector.load %arg3[%10, %c0_2] : memref<16x128xf32, #tpu.memory_space<vmem>>, vector<1x128xf32>
    tpu.vector_store %arg3[%10, %c0_2], %9 {strides = array<i32>} : memref<16x128xf32, #tpu.memory_space<vmem>>, vector<1x128xf32>,
    %c1_i32_3 = arith.constant 1 : i32
    %c1_i32_4 = arith.constant 1 : i32
    %12 = arith.muli %c1_i32_3, %c1_i32_4 : i32
    %c0_i32_5 = arith.constant 0 : i32
    %13 = arith.addi %c0_i32_5, %12 : i32
    %14 = arith.addi %0, %13 : i32
    %15 = arith.index_cast %14 : i32 to index
    %16 = memref.load %arg1[%15] : memref<16xi32, #tpu.memory_space<smem>>
    %c0_i32_6 = arith.constant 0 : i32
    %c63_i32_7 = arith.constant 63 : i32
    %17 = arith.maxsi %c0_i32_6, %16 : i32
    %18 = arith.minsi %c63_i32_7, %17 : i32
    %19 = arith.index_cast %18 : i32 to index
    %c0_8 = arith.constant 0 : index
    %20 = vector.load %arg2[%19, %c0_8] : memref<64x128xf32, #tpu.memory_space<vmem>>, vector<1x128xf32>
    %21 = arith.index_cast %13 : i32 to index
    %c0_9 = arith.constant 0 : index
    %22 = vector.load %arg3[%21, %c0_9] : memref<16x128xf32, #tpu.memory_space<vmem>>, vector<1x128xf32>
    tpu.vector_store %arg3[%21, %c0_9], %20 {strides = array<i32>} : memref<16x128xf32, #tpu.memory_space<vmem>>, vector<1x128xf32>,
    %c2_i32 = arith.constant 2 : i32
    %c1_i32_10 = arith.constant 1 : i32
    %23 = arith.muli %c2_i32, %c1_i32_10 : i32
    %c0_i32_11 = arith.constant 0 : i32
    %24 = arith.addi %c0_i32_11, %23 : i32
    %25 = arith.addi %0, %24 : i32
    %26 = arith.index_cast %25 : i32 to index
    %27 = memref.load %arg1[%26] : memref<16xi32, #tpu.memory_space<smem>>
    %c0_i32_12 = arith.constant 0 : i32
    %c63_i32_13 = arith.constant 63 : i32
    %28 = arith.maxsi %c0_i32_12, %27 : i32
    %29 = arith.minsi %c63_i32_13, %28 : i32
    %30 = arith.index_cast %29 : i32 to index
    %c0_14 = arith.constant 0 : index
    %31 = vector.load %arg2[%30, %c0_14] : memref<64x128xf32, #tpu.memory_space<vmem>>, vector<1x128xf32>
    %32 = arith.index_cast %24 : i32 to index
    %c0_15 = arith.constant 0 : index
    %33 = vector.load %arg3[%32, %c0_15] : memref<16x128xf32, #tpu.memory_space<vmem>>, vector<1x128xf32>
    tpu.vector_store %arg3[%32, %c0_15], %31 {strides = array<i32>} : memref<16x128xf32, #tpu.memory_space<vmem>>, vector<1x128xf32>,
    %c3_i32 = arith.constant 3 : i32
    %c1_i32_16 = arith.constant 1 : i32
    %34 = arith.muli %c3_i32, %c1_i32_16 : i32
    %c0_i32_17 = arith.constant 0 : i32
    %35 = arith.addi %c0_i32_17, %34 : i32
    %36 = arith.addi %0, %35 : i32
    %37 = arith.index_cast %36 : i32 to index
    %38 = memref.load %arg1[%37] : memref<16xi32, #tpu.memory_space<smem>>
    %c0_i32_18 = arith.constant 0 : i32
    %c63_i32_19 = arith.constant 63 : i32
    %39 = arith.maxsi %c0_i32_18, %38 : i32
    %40 = arith.minsi %c63_i32_19, %39 : i32
    %41 = arith.index_cast %40 : i32 to index
    %c0_20 = arith.constant 0 : index
    %42 = vector.load %arg2[%41, %c0_20] : memref<64x128xf32, #tpu.memory_space<vmem>>, vector<1x128xf32>
    %43 = arith.index_cast %35 : i32 to index
    %c0_21 = arith.constant 0 : index
    %44 = vector.load %arg3[%43, %c0_21] : memref<16x128xf32, #tpu.memory_space<vmem>>, vector<1x128xf32>
    tpu.vector_store %arg3[%43, %c0_21], %42 {strides = array<i32>} : memref<16x128xf32, #tpu.memory_space<vmem>>, vector<1x128xf32>,
    %c4_i32 = arith.constant 4 : i32
    %c1_i32_22 = arith.constant 1 : i32
    %45 = arith.muli %c4_i32, %c1_i32_22 : i32
    %c0_i32_23 = arith.constant 0 : i32
    %46 = arith.addi %c0_i32_23, %45 : i32
    %47 = arith.addi %0, %46 : i32
    %48 = arith.index_cast %47 : i32 to index
    %49 = memref.load %arg1[%48] : memref<16xi32, #tpu.memory_space<smem>>
    %c0_i32_24 = arith.constant 0 : i32
    %c63_i32_25 = arith.constant 63 : i32
    %50 = arith.maxsi %c0_i32_24, %49 : i32
    %51 = arith.minsi %c63_i32_25, %50 : i32
    %52 = arith.index_cast %51 : i32 to index
    %c0_26 = arith.constant 0 : index
    %53 = vector.load %arg2[%52, %c0_26] : memref<64x128xf32, #tpu.memory_space<vmem>>, vector<1x128xf32>
    %54 = arith.index_cast %46 : i32 to index
    %c0_27 = arith.constant 0 : index
    %55 = vector.load %arg3[%54, %c0_27] : memref<16x128xf32, #tpu.memory_space<vmem>>, vector<1x128xf32>
    tpu.vector_store %arg3[%54, %c0_27], %53 {strides = array<i32>} : memref<16x128xf32, #tpu.memory_space<vmem>>, vector<1x128xf32>,
    %c5_i32 = arith.constant 5 : i32
    %c1_i32_28 = arith.constant 1 : i32
    %56 = arith.muli %c5_i32, %c1_i32_28 : i32
    %c0_i32_29 = arith.constant 0 : i32
    %57 = arith.addi %c0_i32_29, %56 : i32
    %58 = arith.addi %0, %57 : i32
    %59 = arith.index_cast %58 : i32 to index
    %60 = memref.load %arg1[%59] : memref<16xi32, #tpu.memory_space<smem>>
    %c0_i32_30 = arith.constant 0 : i32
    %c63_i32_31 = arith.constant 63 : i32
    %61 = arith.maxsi %c0_i32_30, %60 : i32
    %62 = arith.minsi %c63_i32_31, %61 : i32
    %63 = arith.index_cast %62 : i32 to index
    %c0_32 = arith.constant 0 : index
    %64 = vector.load %arg2[%63, %c0_32] : memref<64x128xf32, #tpu.memory_space<vmem>>, vector<1x128xf32>
    %65 = arith.index_cast %57 : i32 to index
    %c0_33 = arith.constant 0 : index
    %66 = vector.load %arg3[%65, %c0_33] : memref<16x128xf32, #tpu.memory_space<vmem>>, vector<1x128xf32>
    tpu.vector_store %arg3[%65, %c0_33], %64 {strides = array<i32>} : memref<16x128xf32, #tpu.memory_space<vmem>>, vector<1x128xf32>,
    %c6_i32 = arith.constant 6 : i32
    %c1_i32_34 = arith.constant 1 : i32
    %67 = arith.muli %c6_i32, %c1_i32_34 : i32
    %c0_i32_35 = arith.constant 0 : i32
    %68 = arith.addi %c0_i32_35, %67 : i32
    %69 = arith.addi %0, %68 : i32
    %70 = arith.index_cast %69 : i32 to index
    %71 = memref.load %arg1[%70] : memref<16xi32, #tpu.memory_space<smem>>
    %c0_i32_36 = arith.constant 0 : i32
    %c63_i32_37 = arith.constant 63 : i32
    %72 = arith.maxsi %c0_i32_36, %71 : i32
    %73 = arith.minsi %c63_i32_37, %72 : i32
    %74 = arith.index_cast %73 : i32 to index
    %c0_38 = arith.constant 0 : index
    %75 = vector.load %arg2[%74, %c0_38] : memref<64x128xf32, #tpu.memory_space<vmem>>, vector<1x128xf32>
    %76 = arith.index_cast %68 : i32 to index
    %c0_39 = arith.constant 0 : index
    %77 = vector.load %arg3[%76, %c0_39] : memref<16x128xf32, #tpu.memory_space<vmem>>, vector<1x128xf32>
    tpu.vector_store %arg3[%76, %c0_39], %75 {strides = array<i32>} : memref<16x128xf32, #tpu.memory_space<vmem>>, vector<1x128xf32>,
    %c7_i32 = arith.constant 7 : i32
    %c1_i32_40 = arith.constant 1 : i32
    %78 = arith.muli %c7_i32, %c1_i32_40 : i32
    %c0_i32_41 = arith.constant 0 : i32
    %79 = arith.addi %c0_i32_41, %78 : i32
    %80 = arith.addi %0, %79 : i32
    %81 = arith.index_cast %80 : i32 to index
    %82 = memref.load %arg1[%81] : memref<16xi32, #tpu.memory_space<smem>>
    %c0_i32_42 = arith.constant 0 : i32
    %c63_i32_43 = arith.constant 63 : i32
    %83 = arith.maxsi %c0_i32_42, %82 : i32
    %84 = arith.minsi %c63_i32_43, %83 : i32
    %85 = arith.index_cast %84 : i32 to index
    %c0_44 = arith.constant 0 : index
    %86 = vector.load %arg2[%85, %c0_44] : memref<64x128xf32, #tpu.memory_space<vmem>>, vector<1x128xf32>
    %87 = arith.index_cast %79 : i32 to index
    %c0_45 = arith.constant 0 : index
    %88 = vector.load %arg3[%87, %c0_45] : memref<16x128xf32, #tpu.memory_space<vmem>>, vector<1x128xf32>
    tpu.vector_store %arg3[%87, %c0_45], %86 {strides = array<i32>} : memref<16x128xf32, #tpu.memory_space<vmem>>, vector<1x128xf32>,
    %c8_i32 = arith.constant 8 : i32
    %c1_i32_46 = arith.constant 1 : i32
    %89 = arith.muli %c8_i32, %c1_i32_46 : i32
    %c0_i32_47 = arith.constant 0 : i32
    %90 = arith.addi %c0_i32_47, %89 : i32
    %91 = arith.addi %0, %90 : i32
    %92 = arith.index_cast %91 : i32 to index
    %93 = memref.load %arg1[%92] : memref<16xi32, #tpu.memory_space<smem>>
    %c0_i32_48 = arith.constant 0 : i32
    %c63_i32_49 = arith.constant 63 : i32
    %94 = arith.maxsi %c0_i32_48, %93 : i32
    %95 = arith.minsi %c63_i32_49, %94 : i32
    %96 = arith.index_cast %95 : i32 to index
    %c0_50 = arith.constant 0 : index
    %97 = vector.load %arg2[%96, %c0_50] : memref<64x128xf32, #tpu.memory_space<vmem>>, vector<1x128xf32>
    %98 = arith.index_cast %90 : i32 to index
    %c0_51 = arith.constant 0 : index
    %99 = vector.load %arg3[%98, %c0_51] : memref<16x128xf32, #tpu.memory_space<vmem>>, vector<1x128xf32>
    tpu.vector_store %arg3[%98, %c0_51], %97 {strides = array<i32>} : memref<16x128xf32, #tpu.memory_space<vmem>>, vector<1x128xf32>,
    %c9_i32 = arith.constant 9 : i32
    %c1_i32_52 = arith.constant 1 : i32
    %100 = arith.muli %c9_i32, %c1_i32_52 : i32
    %c0_i32_53 = arith.constant 0 : i32
    %101 = arith.addi %c0_i32_53, %100 : i32
    %102 = arith.addi %0, %101 : i32
    %103 = arith.index_cast %102 : i32 to index
    %104 = memref.load %arg1[%103] : memref<16xi32, #tpu.memory_space<smem>>
    %c0_i32_54 = arith.constant 0 : i32
    %c63_i32_55 = arith.constant 63 : i32
    %105 = arith.maxsi %c0_i32_54, %104 : i32
    %106 = arith.minsi %c63_i32_55, %105 : i32
    %107 = arith.index_cast %106 : i32 to index
    %c0_56 = arith.constant 0 : index
    %108 = vector.load %arg2[%107, %c0_56] : memref<64x128xf32, #tpu.memory_space<vmem>>, vector<1x128xf32>
    %109 = arith.index_cast %101 : i32 to index
    %c0_57 = arith.constant 0 : index
    %110 = vector.load %arg3[%109, %c0_57] : memref<16x128xf32, #tpu.memory_space<vmem>>, vector<1x128xf32>
    tpu.vector_store %arg3[%109, %c0_57], %108 {strides = array<i32>} : memref<16x128xf32, #tpu.memory_space<vmem>>, vector<1x128xf32>,
    %c10_i32 = arith.constant 10 : i32
    %c1_i32_58 = arith.constant 1 : i32
    %111 = arith.muli %c10_i32, %c1_i32_58 : i32
    %c0_i32_59 = arith.constant 0 : i32
    %112 = arith.addi %c0_i32_59, %111 : i32
    %113 = arith.addi %0, %112 : i32
    %114 = arith.index_cast %113 : i32 to index
    %115 = memref.load %arg1[%114] : memref<16xi32, #tpu.memory_space<smem>>
    %c0_i32_60 = arith.constant 0 : i32
    %c63_i32_61 = arith.constant 63 : i32
    %116 = arith.maxsi %c0_i32_60, %115 : i32
    %117 = arith.minsi %c63_i32_61, %116 : i32
    %118 = arith.index_cast %117 : i32 to index
    %c0_62 = arith.constant 0 : index
    %119 = vector.load %arg2[%118, %c0_62] : memref<64x128xf32, #tpu.memory_space<vmem>>, vector<1x128xf32>
    %120 = arith.index_cast %112 : i32 to index
    %c0_63 = arith.constant 0 : index
    %121 = vector.load %arg3[%120, %c0_63] : memref<16x128xf32, #tpu.memory_space<vmem>>, vector<1x128xf32>
    tpu.vector_store %arg3[%120, %c0_63], %119 {strides = array<i32>} : memref<16x128xf32, #tpu.memory_space<vmem>>, vector<1x128xf32>,
    %c11_i32 = arith.constant 11 : i32
    %c1_i32_64 = arith.constant 1 : i32
    %122 = arith.muli %c11_i32, %c1_i32_64 : i32
    %c0_i32_65 = arith.constant 0 : i32
    %123 = arith.addi %c0_i32_65, %122 : i32
    %124 = arith.addi %0, %123 : i32
    %125 = arith.index_cast %124 : i32 to index
    %126 = memref.load %arg1[%125] : memref<16xi32, #tpu.memory_space<smem>>
    %c0_i32_66 = arith.constant 0 : i32
    %c63_i32_67 = arith.constant 63 : i32
    %127 = arith.maxsi %c0_i32_66, %126 : i32
    %128 = arith.minsi %c63_i32_67, %127 : i32
    %129 = arith.index_cast %128 : i32 to index
    %c0_68 = arith.constant 0 : index
    %130 = vector.load %arg2[%129, %c0_68] : memref<64x128xf32, #tpu.memory_space<vmem>>, vector<1x128xf32>
    %131 = arith.index_cast %123 : i32 to index
    %c0_69 = arith.constant 0 : index
    %132 = vector.load %arg3[%131, %c0_69] : memref<16x128xf32, #tpu.memory_space<vmem>>, vector<1x128xf32>
    tpu.vector_store %arg3[%131, %c0_69], %130 {strides = array<i32>} : memref<16x128xf32, #tpu.memory_space<vmem>>, vector<1x128xf32>,
    %c12_i32 = arith.constant 12 : i32
    %c1_i32_70 = arith.constant 1 : i32
    %133 = arith.muli %c12_i32, %c1_i32_70 : i32
    %c0_i32_71 = arith.constant 0 : i32
    %134 = arith.addi %c0_i32_71, %133 : i32
    %135 = arith.addi %0, %134 : i32
    %136 = arith.index_cast %135 : i32 to index
    %137 = memref.load %arg1[%136] : memref<16xi32, #tpu.memory_space<smem>>
    %c0_i32_72 = arith.constant 0 : i32
    %c63_i32_73 = arith.constant 63 : i32
    %138 = arith.maxsi %c0_i32_72, %137 : i32
    %139 = arith.minsi %c63_i32_73, %138 : i32
    %140 = arith.index_cast %139 : i32 to index
    %c0_74 = arith.constant 0 : index
    %141 = vector.load %arg2[%140, %c0_74] : memref<64x128xf32, #tpu.memory_space<vmem>>, vector<1x128xf32>
    %142 = arith.index_cast %134 : i32 to index
    %c0_75 = arith.constant 0 : index
    %143 = vector.load %arg3[%142, %c0_75] : memref<16x128xf32, #tpu.memory_space<vmem>>, vector<1x128xf32>
    tpu.vector_store %arg3[%142, %c0_75], %141 {strides = array<i32>} : memref<16x128xf32, #tpu.memory_space<vmem>>, vector<1x128xf32>,
    %c13_i32 = arith.constant 13 : i32
    %c1_i32_76 = arith.constant 1 : i32
    %144 = arith.muli %c13_i32, %c1_i32_76 : i32
    %c0_i32_77 = arith.constant 0 : i32
    %145 = arith.addi %c0_i32_77, %144 : i32
    %146 = arith.addi %0, %145 : i32
    %147 = arith.index_cast %146 : i32 to index
    %148 = memref.load %arg1[%147] : memref<16xi32, #tpu.memory_space<smem>>
    %c0_i32_78 = arith.constant 0 : i32
    %c63_i32_79 = arith.constant 63 : i32
    %149 = arith.maxsi %c0_i32_78, %148 : i32
    %150 = arith.minsi %c63_i32_79, %149 : i32
    %151 = arith.index_cast %150 : i32 to index
    %c0_80 = arith.constant 0 : index
    %152 = vector.load %arg2[%151, %c0_80] : memref<64x128xf32, #tpu.memory_space<vmem>>, vector<1x128xf32>
    %153 = arith.index_cast %145 : i32 to index
    %c0_81 = arith.constant 0 : index
    %154 = vector.load %arg3[%153, %c0_81] : memref<16x128xf32, #tpu.memory_space<vmem>>, vector<1x128xf32>
    tpu.vector_store %arg3[%153, %c0_81], %152 {strides = array<i32>} : memref<16x128xf32, #tpu.memory_space<vmem>>, vector<1x128xf32>,
    %c14_i32 = arith.constant 14 : i32
    %c1_i32_82 = arith.constant 1 : i32
    %155 = arith.muli %c14_i32, %c1_i32_82 : i32
    %c0_i32_83 = arith.constant 0 : i32
    %156 = arith.addi %c0_i32_83, %155 : i32
    %157 = arith.addi %0, %156 : i32
    %158 = arith.index_cast %157 : i32 to index
    %159 = memref.load %arg1[%158] : memref<16xi32, #tpu.memory_space<smem>>
    %c0_i32_84 = arith.constant 0 : i32
    %c63_i32_85 = arith.constant 63 : i32
    %160 = arith.maxsi %c0_i32_84, %159 : i32
    %161 = arith.minsi %c63_i32_85, %160 : i32
    %162 = arith.index_cast %161 : i32 to index
    %c0_86 = arith.constant 0 : index
    %163 = vector.load %arg2[%162, %c0_86] : memref<64x128xf32, #tpu.memory_space<vmem>>, vector<1x128xf32>
    %164 = arith.index_cast %156 : i32 to index
    %c0_87 = arith.constant 0 : index
    %165 = vector.load %arg3[%164, %c0_87] : memref<16x128xf32, #tpu.memory_space<vmem>>, vector<1x128xf32>
    tpu.vector_store %arg3[%164, %c0_87], %163 {strides = array<i32>} : memref<16x128xf32, #tpu.memory_space<vmem>>, vector<1x128xf32>,
    %c15_i32 = arith.constant 15 : i32
    %c1_i32_88 = arith.constant 1 : i32
    %166 = arith.muli %c15_i32, %c1_i32_88 : i32
    %c0_i32_89 = arith.constant 0 : i32
    %167 = arith.addi %c0_i32_89, %166 : i32
    %168 = arith.addi %0, %167 : i32
    %169 = arith.index_cast %168 : i32 to index
    %170 = memref.load %arg1[%169] : memref<16xi32, #tpu.memory_space<smem>>
    %c0_i32_90 = arith.constant 0 : i32
    %c63_i32_91 = arith.constant 63 : i32
    %171 = arith.maxsi %c0_i32_90, %170 : i32
    %172 = arith.minsi %c63_i32_91, %171 : i32
    %173 = arith.index_cast %172 : i32 to index
    %c0_92 = arith.constant 0 : index
    %174 = vector.load %arg2[%173, %c0_92] : memref<64x128xf32, #tpu.memory_space<vmem>>, vector<1x128xf32>
    %175 = arith.index_cast %167 : i32 to index
    %c0_93 = arith.constant 0 : index
    %176 = vector.load %arg3[%175, %c0_93] : memref<16x128xf32, #tpu.memory_space<vmem>>, vector<1x128xf32>
    tpu.vector_store %arg3[%175, %c0_93], %174 {strides = array<i32>} : memref<16x128xf32, #tpu.memory_space<vmem>>, vector<1x128xf32>,
    %c16_i32_94 = arith.constant 16 : i32
    return
  }
  func.func @transform_0(%arg0: i32, %arg1: memref<16xi32, #tpu.memory_space<smem>>) -> (i32, i32) {
    %c0_i32 = arith.constant 0 : i32
    %c0_i32_0 = arith.constant 0 : i32
    %c0_i32_1 = arith.constant 0 : i32
    return %c0_i32, %c0_i32_0 : i32, i32
  }
  func.func @transform_1(%arg0: i32, %arg1: memref<16xi32, #tpu.memory_space<smem>>) -> (i32, i32) {
    %c0_i32 = arith.constant 0 : i32
    %c0_i32_0 = arith.constant 0 : i32
    return %arg0, %c0_i32 : i32, i32
  }
}

</mosaic_0001>

<bundles_post_ra>
// kernel: tpu_custom_call.1
= control target key start
LH: loop header
LB: loop body
LE: loop exit
PB: predicated region body
PF: predicated region fallthrough
CT: control target
= control target key end

     0   :  { %s411_s12 = smov [#allocation3]   ;;  %s469_s0 = inlined_call_operand.hbm [shape: s32[16], index: 0, kind: input, shape index: {}]   ;;  %s470_s1 = inlined_call_operand.hbm [shape: f32[64,128], index: 1, kind: input, shape index: {}]   ;;  %s471_s2 = inlined_call_operand.hbm [shape: f32[16,128], index: 2, kind: output, shape index: {}]  }
   0x1   :  { %s8_s11 = sshll.u32 %s469_s0, 4  ;;  %s9_s11 = int_to_ptr.hbm [resolvable:$true] %s8_s11 }
   0x2   :  { %11 = dma.hbm_to_smem %s9_s11, 16, %s411_s12, [#allocation2] }
   0x3   :  { %405 = dma.done.wait [#allocation2], 16 }
   0x4   :  { %406 = vsyncadd [#allocation2], 4294967280 }
   0x5   :  { %14 = sfence }
   0x6   :  { %15 = vsyncpa [#allocation5], 0 }
   0x7   :  { %16 = vsyncpa [#allocation6], 0  ;;  %s21_s15 = sshll.u32 %s470_s1, 4  ;;  %s412_s16 = smov [#allocation4]   ;;  %s22_s15 = int_to_ptr.hbm [resolvable:$true] %s21_s15 }
   0x8   :  { %s23_s17 = sshll.u32 %s412_s16, 4  ;;  %s413_s18 = smov 128   ;;  %s24_s17 = int_to_ptr.vmem [resolvable:$true] %s23_s17 }
   0x9   :  { %s414_s19 = smov 8  }
   0xa   :  { %29 = dma.hbm_to_vmem [thread:$0]  %s22_s15, 1024, %s24_s17, [#allocation5], %s413_s18, %s413_s18, %s414_s19  }
   0xb   :  { %407 = dma.done.wait [#allocation5], 1024  }
   0xc   :  { %408 = vsyncadd [#allocation5], 4294966272  ;;  %s35_s0 = sld [smem:[#allocation3]] }
   0xd   :  { %s218_s20 = sld [smem:[#allocation3 + $0x1]] }
   0xe   :  { %s224_s21 = sld [smem:[#allocation3 + $0x2]] }
   0xf   :  { %s230_s22 = sld [smem:[#allocation3 + $0x3]] }
  0x10   :  { %s440_s23 = sld [smem:[#allocation3 + $0x4]] }
  0x11   :  { %s442_s24 = sld [smem:[#allocation3 + $0x5]] }
  0x12   :  { %p36_p0 = scmp.gt.s32.totalorder %s35_s0, 0  ;;  %p213_p1 = scmp.lt.s32.totalorder %s35_s0, 63 }
  0x13   :  { %p45_p2 = scmp.gt.s32.totalorder %s218_s20, 0  ;;  %p219_p3 = scmp.lt.s32.totalorder %s218_s20, 63 }
  0x14   :  { %s473_s0 = smov (!%p36_p0, %s35_s0), 0  ;;  %p54_p4 = scmp.gt.s32.totalorder %s224_s21, 0 }
  0x15   :  { %s475_s20 = smov (!%p45_p2, %s218_s20), 0  ;;  %s477_s0 = smov (!%p213_p1, %s473_s0), 63 }
  0x16   :  { %s479_s20 = smov (!%p219_p3, %s475_s20), 63  ;;  %s40_s1 = scalar_lea.vmem [#allocation4], %s477_s0 }
  0x17   :  { %v41_v0 = vld [vmem:[%s40_s1] sm:$0x1]  ;;  %p225_p5 = scmp.lt.s32.totalorder %s224_s21, 63  ;;  %s49_s25 = scalar_lea.vmem [#allocation4], %s479_s20 }
  0x18   :  { %42 = vst [vmem:[#allocation7] sm:$0x1] %v41_v0  ;;  %v50_v1 = vld [vmem:[%s49_s25] sm:$0x1]  ;;  %s481_s21 = smov (!%p54_p4, %s224_s21), 0  ;;  %p63_p6 = scmp.gt.s32.totalorder %s230_s22, 0 }
  0x19   :  { %51 = vst [vmem:[#allocation7 + $0x1] sm:$0x1] %v50_v1  ;;  %p231_p7 = scmp.lt.s32.totalorder %s230_s22, 63  ;;  %s483_s21 = smov (!%p225_p5, %s481_s21), 63 }
  0x1a   :  { %s485_s22 = smov (!%p63_p6, %s230_s22), 0  ;;  %p72_p8 = scmp.gt.s32.totalorder %s440_s23, 0 }
  0x1b   :  { %s58_s26 = scalar_lea.vmem [#allocation4], %s483_s21  ;;  %s487_s22 = smov (!%p231_p7, %s485_s22), 63 }
  0x1c   :  { %v59_v2 = vld [vmem:[%s58_s26] sm:$0x1]  ;;  %s73_s27 = scalar_select %p72_p8, %s440_s23, 0 }
  0x1d   :  { %60 = vst [vmem:[#allocation7 + $0x2] sm:$0x1] %v59_v2  ;;  %p237_p9 = scmp.lt.s32.totalorder %s440_s23, 63  ;;  %s67_s28 = scalar_lea.vmem [#allocation4], %s487_s22 }
  0x1e   :  { %v68_v3 = vld [vmem:[%s67_s28] sm:$0x1]  ;;  %p81_p10 = scmp.gt.s32.totalorder %s442_s24, 0  ;;  %p243_p11 = scmp.lt.s32.totalorder %s442_s24, 63 }
  0x1f   :  { %69 = vst [vmem:[#allocation7 + $0x3] sm:$0x1] %v68_v3  ;;  %s489_s27 = smov (!%p237_p9, %s73_s27), 63  ;;  %s248_s29 = sld [smem:[#allocation3 + $0x6]] }
  0x20   :  { %s491_s24 = smov (!%p81_p10, %s442_s24), 0  ;;  %s76_s30 = scalar_lea.vmem [#allocation4], %s489_s27 }
  0x21   :  { %v77_v4 = vld [vmem:[%s76_s30] sm:$0x1]  ;;  %s493_s24 = smov (!%p243_p11, %s491_s24), 63  ;;  %s254_s3 = sld [smem:[#allocation3 + $0x7]] }
  0x22   :  { %78 = vst [vmem:[#allocation7 + $0x4] sm:$0x1] %v77_v4  ;;  %s260_s4 = sld [smem:[#allocation3 + $0x8]]  ;;  %s85_s5 = scalar_lea.vmem [#allocation4], %s493_s24 }
  0x23   :  { %v86_v5 = vld [vmem:[%s85_s5] sm:$0x1]  ;;  %s266_s6 = sld [smem:[#allocation3 + $0x9]]  ;;  %s415_s22 = smov [#allocation7]  }
  0x24   :  { %87 = vst [vmem:[#allocation7 + $0x5] sm:$0x1] %v86_v5  ;;  %s450_s7 = sld [smem:[#allocation3 + $0xa]]  ;;  %s460_s23 = sshll.u32 %s415_s22, 4  ;;  %s183_s23 = int_to_ptr.vmem [resolvable:$true] %s460_s23 }
  0x25   :  { %p90_p12 = scmp.gt.s32.totalorder %s248_s29, 0  ;;  %p249_p13 = scmp.lt.s32.totalorder %s248_s29, 63 }
  0x26   :  { %s452_s8 = sld [smem:[#allocation3 + $0xb]]  ;;  %s184_s28 = sshll.u32 %s471_s2, 4  ;;  %s185_s28 = int_to_ptr.hbm [resolvable:$true] %s184_s28 }
  0x27   :  { %s495_s29 = smov (!%p90_p12, %s248_s29), 0  ;;  %p99_p0 = scmp.gt.s32.totalorder %s254_s3, 0 }
  0x28   :  { %p255_p1 = scmp.lt.s32.totalorder %s254_s3, 63  ;;  %s497_s29 = smov (!%p249_p13, %s495_s29), 63 }
  0x29   :  { %s499_s3 = smov (!%p99_p0, %s254_s3), 0  ;;  %p108_p2 = scmp.gt.s32.totalorder %s260_s4, 0 }
  0x2a   :  { %s94_s9 = scalar_lea.vmem [#allocation4], %s497_s29  ;;  %s501_s3 = smov (!%p255_p1, %s499_s3), 63 }
  0x2b   :  { %v95_v6 = vld [vmem:[%s94_s9] sm:$0x1]  ;;  %s109_s10 = scalar_select %p108_p2, %s260_s4, 0 }
  0x2c   :  { %96 = vst [vmem:[#allocation7 + $0x6] sm:$0x1] %v95_v6  ;;  %p261_p3 = scmp.lt.s32.totalorder %s260_s4, 63  ;;  %s103_s11 = scalar_lea.vmem [#allocation4], %s501_s3 }
  0x2d   :  { %v104_v7 = vld [vmem:[%s103_s11] sm:$0x1]  ;;  %p117_p4 = scmp.gt.s32.totalorder %s266_s6, 0  ;;  %p267_p5 = scmp.lt.s32.totalorder %s266_s6, 63 }
  0x2e   :  { %105 = vst [vmem:[#allocation7 + $0x7] sm:$0x1] %v104_v7  ;;  %s503_s10 = smov (!%p261_p3, %s109_s10), 63  ;;  %p126_p6 = scmp.gt.s32.totalorder %s450_s7, 0 }
  0x2f   :  { %s505_s6 = smov (!%p117_p4, %s266_s6), 0  ;;  %s112_s12 = scalar_lea.vmem [#allocation4], %s503_s10 }
  0x30   :  { %v113_v8 = vld [vmem:[%s112_s12] sm:$0x1]  ;;  %s507_s6 = smov (!%p267_p5, %s505_s6), 63  ;;  %p273_p7 = scmp.lt.s32.totalorder %s450_s7, 63 }
  0x31   :  { %114 = vst [vmem:[#allocation7 + $0x8] sm:$0x1] %v113_v8  ;;  %s127_s13 = scalar_select %p126_p6, %s450_s7, 0 }
  0x32   :  { %s121_s14 = scalar_lea.vmem [#allocation4], %s507_s6  ;;  %p135_p8 = scmp.gt.s32.totalorder %s452_s8, 0 }
  0x33   :  { %v122_v9 = vld [vmem:[%s121_s14] sm:$0x1]  ;;  %p279_p9 = scmp.lt.s32.totalorder %s452_s8, 63  ;;  %s509_s13 = smov (!%p273_p7, %s127_s13), 63 }
  0x34   :  { %123 = vst [vmem:[#allocation7 + $0x9] sm:$0x1] %v122_v9  ;;  %s511_s8 = smov (!%p135_p8, %s452_s8), 0  ;;  %s284_s15 = sld [smem:[#allocation3 + $0xc]] }
  0x35   :  { %s130_s16 = scalar_lea.vmem [#allocation4], %s509_s13  ;;  %s513_s8 = smov (!%p279_p9, %s511_s8), 63 }
  0x36   :  { %v131_v10 = vld [vmem:[%s130_s16] sm:$0x1]  ;;  %s290_s17 = sld [smem:[#allocation3 + $0xd]]  ;;  %s139_s0 = scalar_lea.vmem [#allocation4], %s513_s8 }
  0x37   :  { %132 = vst [vmem:[#allocation7 + $0xa] sm:$0x1] %v131_v10  ;;  %v140_v11 = vld [vmem:[%s139_s0] sm:$0x1]  ;;  %s296_s20 = sld [smem:[#allocation3 + $0xe]] }
  0x38   :  { %141 = vst [vmem:[#allocation7 + $0xb] sm:$0x1] %v140_v11  ;;  %s302_s21 = sld [smem:[#allocation3 + $0xf]] }
  0x3a   :  { %p144_p10 = scmp.gt.s32.totalorder %s284_s15, 0  ;;  %p285_p11 = scmp.lt.s32.totalorder %s284_s15, 63 }
  0x3c   :  { %s515_s15 = smov (!%p144_p10, %s284_s15), 0  ;;  %p153_p12 = scmp.gt.s32.totalorder %s290_s17, 0 }
  0x3d   :  { %p291_p13 = scmp.lt.s32.totalorder %s290_s17, 63  ;;  %s517_s15 = smov (!%p285_p11, %s515_s15), 63 }
  0x3e   :  { %s519_s17 = smov (!%p153_p12, %s290_s17), 0  ;;  %p162_p0 = scmp.gt.s32.totalorder %s296_s20, 0 }
  0x3f   :  { %s148_s24 = scalar_lea.vmem [#allocation4], %s517_s15  ;;  %s521_s17 = smov (!%p291_p13, %s519_s17), 63 }
  0x40   :  { %v149_v12 = vld [vmem:[%s148_s24] sm:$0x1]  ;;  %s163_s1 = scalar_select %p162_p0, %s296_s20, 0 }
  0x41   :  { %150 = vst [vmem:[#allocation7 + $0xc] sm:$0x1] %v149_v12  ;;  %p297_p1 = scmp.lt.s32.totalorder %s296_s20, 63  ;;  %s157_s25 = scalar_lea.vmem [#allocation4], %s521_s17 }
  0x42   :  { %v158_v13 = vld [vmem:[%s157_s25] sm:$0x1]  ;;  %p171_p2 = scmp.gt.s32.totalorder %s302_s21, 0  ;;  %p303_p3 = scmp.lt.s32.totalorder %s302_s21, 63 }
  0x43   :  { %159 = vst [vmem:[#allocation7 + $0xd] sm:$0x1] %v158_v13  ;;  %s523_s1 = smov (!%p297_p1, %s163_s1), 63 }
  0x44   :  { %s525_s21 = smov (!%p171_p2, %s302_s21), 0  ;;  %s166_s29 = scalar_lea.vmem [#allocation4], %s523_s1 }
  0x45   :  { %v167_v14 = vld [vmem:[%s166_s29] sm:$0x1]  ;;  %s527_s21 = smov (!%p303_p3, %s525_s21), 63 }
  0x46   :  { %168 = vst [vmem:[#allocation7 + $0xe] sm:$0x1] %v167_v14  ;;  %s175_s30 = scalar_lea.vmem [#allocation4], %s527_s21 }
  0x47   :  { %v176_v15 = vld [vmem:[%s175_s30] sm:$0x1] }
  0x48   :  { %177 = vst [vmem:[#allocation7 + $0xf] sm:$0x1] %v176_v15 }
  0x49   :  { %190 = dma.vmem_to_hbm [thread:$0]  %s183_s23, 256, %s185_s28, [#allocation6], %s413_s18, %s413_s18, %s414_s19  }
  0x4a   :  { %409 = dma.done.wait [#allocation6], 256  }
  0x4b   :  { %410 = vsyncadd [#allocation6], 4294967040 }
  0x4c   :  { %195 = vsyncpa [#allocation5], 1 }
  0x4d   :  { %196 = vsyncpa [#allocation6], 1 }

</bundles_post_ra>
